<compile_context>
chip_gen: v5e
topology: v5e:2x2
jax: 0.10.0
libtpu: 0.0.40
codegen_flags: <defaults>
</compile_context>

<pallas_src>
import jax
import jax.numpy as jnp
from jax.experimental import pallas as pl
from jax.experimental.pallas import tpu as pltpu

EPS = 1e-8


def nn_kernel(t_ref, wi_ref, bi_ref, wh_ref, bh_ref, wo_ref, bo_ref, out_ref):
    """Transposed dataflow: the batch lives on the 128-lane axis.

    t_ref  : (n_in, TB)  f32     wi_ref : (H, n_in)   f32 (n_in==1) / mm dtype
    bi_ref : (H, 1)      f32     wh_ref : (L-1, H, H) mm dtype
    bh_ref : (L-1, H, 1) f32     wo_ref : (n_out, H)  mm dtype
    bo_ref : (n_out, 1)  f32     out_ref: (out_dim, TB) f32
    """
    mm_dtype = wh_ref.dtype
    t = t_ref[...]                                            # (n_in, TB) f32

    # ---- input layer (Linear + Tanh) ----------------------------------------
    if t_ref.shape[0] == 1:
        # K == 1: skip the MXU entirely; VPU broadcast outer product (f32).
        h32 = jnp.tanh(wi_ref[...] * t + bi_ref[...])         # (H, TB) f32
    else:
        h32 = jnp.tanh(
            jnp.dot(wi_ref[...], t.astype(mm_dtype),
                    preferred_element_type=jnp.float32)
            + bi_ref[...]
        )

    # ---- hidden layers: (N_LAYERS - 1) x (Linear + Tanh), static unroll -----
    # Matmul operands in mm_dtype (bf16 by default -> fewer MXU passes);
    # accumulation, bias add and tanh stay f32.
    # TODO(synk): on v6e/v7x a bf16 tanh roughly halves EUP time; kept f32 here
    # for a single numerically-tight, chip-portable path (v5e has no bf16 EUP).
    for l in range(wh_ref.shape[0]):
        h32 = jnp.tanh(
            jnp.dot(wh_ref[l], h32.astype(mm_dtype),
                    preferred_element_type=jnp.float32)
            + bh_ref[l]
        )

    # ---- output layer (Linear, no activation) -------------------------------
    # Tiny (n_out x H) matmul: with bf16 operands and large TB the MXU is no
    # longer the binding unit (EUP tanh is), so a VPU/XLU reformulation of this
    # dot was evaluated and not adopted.
    xy = (
        jnp.dot(wo_ref[...], h32.astype(mm_dtype),
                preferred_element_type=jnp.float32)
        + bo_ref[...]
    )                                                         # (n_out, TB) f32

    # ---- trajectory transform (pure VPU epilogue, lane-dense store) ---------
    g = 2.0 * t - 1.0
    phi = t * (1.0 - t)
    out_ref[...] = g + (phi + EPS) * xy


def _choose_tile(B, block_b):
    """Pick the batch tile TB and the padded batch Bp.

    Big tiles amortize the ~0.35us per-grid-step overhead; for large B, TB is
    also capped at round_up(ceil(B/2), 512) so the grid has >= 2 steps and the
    batch axis can split across both TensorCores on v7x.
    """
    if B <= 512:
        return B, B                       # single full-array block ((8,128) exempt)
    tb = min(block_b, pl.cdiv(pl.cdiv(B, 2), 512) * 512)
    tb = max(tb, 128)
    bp = pl.cdiv(B, tb) * tb
    return tb, bp


def nn_forward(t, wi, bi, wh, bh, wo, bo, *, block_b=4096,
               matmul_dtype=jnp.bfloat16, return_transposed=False):
    """t: (B, n_in) f32.  Weights in PyTorch (out_features, in_features) layout,
    biases kept 2-D as (out_features, 1).  Returns (B, out_dim) f32 (or
    (out_dim, B) if return_transposed=True)."""
    B, n_in = t.shape
    H = wi.shape[0]
    n_out = wo.shape[0]
    n_hidden = wh.shape[0]

    # Torch broadcasting of g/phi (B, n_in) against xy (B, n_out) only makes
    # sense when one side is 1 (or they match) -- guard it explicitly.
    if not (n_in == 1 or n_out == 1 or n_in == n_out):
        raise ValueError(f"cannot broadcast n_in={n_in} against n_out={n_out}")
    out_dim = max(n_in, n_out)

    # Matmul operands in a (usually) narrower dtype; biases, accumulation and
    # the epilogue stay f32.  The n_in == 1 input layer runs on the VPU in f32.
    wi_c = wi if n_in == 1 else wi.astype(matmul_dtype)
    wh_c = wh.astype(matmul_dtype)
    wo_c = wo.astype(matmul_dtype)

    # Batch on lanes (layout plumbing only).
    tT = jnp.transpose(t)                                     # (n_in, B)

    TB, Bp = _choose_tile(B, block_b)
    if Bp != B:
        tT = jnp.pad(tT, ((0, 0), (0, Bp - B)))
    grid = (Bp // TB,)

    # Advisory cost hint for XLA's scheduler (e.g. inside an L-BFGS loop).
    flops = 2 * Bp * (n_in * H + n_hidden * H * H + H * n_out) + 5 * Bp * out_dim
    transcendentals = Bp * H * (n_hidden + 1)
    bytes_accessed = int(
        4 * (n_in * Bp + out_dim * Bp)
        + wi_c.size * wi_c.dtype.itemsize + bi.size * 4
        + wh_c.size * wh_c.dtype.itemsize + bh.size * 4
        + wo_c.size * wo_c.dtype.itemsize + bo.size * 4
    )

    def const(ndim):
        return lambda i: (0,) * ndim

    in_specs = [
        pl.BlockSpec((n_in, TB), lambda i: (0, i)),       # t: tiled over batch
        pl.BlockSpec((H, n_in), const(2)),                # weights: VMEM-resident
        pl.BlockSpec((H, 1), const(2)),
        pl.BlockSpec((n_hidden, H, H), const(3)),
        pl.BlockSpec((n_hidden, H, 1), const(3)),
        pl.BlockSpec((n_out, H), const(2)),
        pl.BlockSpec((n_out, 1), const(2)),
    ]
    out_spec = pl.BlockSpec((out_dim, TB), lambda i: (0, i))
    cost = pl.CostEstimate(flops=flops, transcendentals=transcendentals,
                           bytes_accessed=bytes_accessed)

    # Prefer CORE_PARALLEL when the grid actually has >= 2 steps (guarantees the
    # batch axis splits across both TensorCores on v7x); fall back to plain
    # PARALLEL where the chip / runtime rejects it.
    semantics_candidates = []
    if grid[0] >= 2:
        semantics_candidates.append((pltpu.CORE_PARALLEL,))
    semantics_candidates.append((pltpu.PARALLEL,))

    outT = None
    last_err = None
    for sem in semantics_candidates:
        call = pl.pallas_call(
            nn_kernel,
            out_shape=jax.ShapeDtypeStruct((out_dim, Bp), jnp.float32),
            grid=grid,
            in_specs=in_specs,
            out_specs=out_spec,
            compiler_params=pltpu.CompilerParams(
                dimension_semantics=sem,
                vmem_limit_bytes=32 * 1024 * 1024,
            ),
            cost_estimate=cost,
        )
        try:
            outT = call(tT, wi_c, bi, wh_c, bh, wo_c, bo)
            break
        except Exception as e:   # chip-dependent lowering; retry with PARALLEL
            last_err = e
    if outT is None:
        raise last_err

    if return_transposed:
        return outT[:, :B]                        # (out_dim, B), no transpose
    # Slice BEFORE transposing so the transpose touches only B*out_dim elems.
    return jnp.transpose(outT[:, :B])             # (B, out_dim)


def init_params(key, n_input, n_output, n_neurons, n_layers):
    """PyTorch-Linear-style init U(-1/sqrt(fan_in), 1/sqrt(fan_in)).
    Weights stored as (out_features, in_features); biases as (out_features, 1)."""
    ks = jax.random.split(key, 6)

    def u(k, shape, fan_in):
        bound = 1.0 / jnp.sqrt(jnp.float32(fan_in))
        return jax.random.uniform(k, shape, jnp.float32, -bound, bound)

    wi = u(ks[0], (n_neurons, n_input), n_input)
    bi = u(ks[1], (n_neurons, 1), n_input)
    wh = u(ks[2], (n_layers - 1, n_neurons, n_neurons), n_neurons)
    bh = u(ks[3], (n_layers - 1, n_neurons, 1), n_neurons)
    wo = u(ks[4], (n_output, n_neurons), n_neurons)
    bo = u(ks[5], (n_output, 1), n_neurons)
    return wi, bi, wh, bh, wo, bo


def nn_reference(t, wi, bi, wh, bh, wo, bo):
    """Pure-JAX f32 reference in the torch row-major convention."""
    h = jnp.tanh(t @ wi.T + bi[:, 0])
    for l in range(wh.shape[0]):
        h = jnp.tanh(h @ wh[l].T + bh[l, :, 0])
    xy = h @ wo.T + bo[:, 0]
    g = 2.0 * t - 1.0
    phi = t * (1.0 - t)
    return g + (phi + EPS) * xy


if __name__ == "__main__":
    # Small shapes consistent with the module: t is a time column, xy a 2-D trajectory.
    N_INPUT, N_OUTPUT, N_NEURONS, N_LAYERS = 1, 2, 32, 3
    BATCH = 8

    key = jax.random.PRNGKey(0)
    k_t, k_p = jax.random.split(key)
    t = jax.random.uniform(k_t, (BATCH, N_INPUT), jnp.float32)      # t in [0, 1)
    params = init_params(k_p, N_INPUT, N_OUTPUT, N_NEURONS, N_LAYERS)
    ref = nn_reference(t, *params)

    # 1) f32-matmul path, single full-array block: tight numerical check.
    out = jax.block_until_ready(nn_forward(t, *params, matmul_dtype=jnp.float32))
    assert out.shape == (BATCH, N_OUTPUT), out.shape
    assert jnp.allclose(out, ref, atol=1e-4, rtol=1e-4), "mismatch vs reference (f32 path)"

    # 2) Default bf16-matmul path with a tiled / pipelined grid (>=2 steps),
    #    non-multiple-of-TB batch exercises padding + slice + CORE_PARALLEL fallback.
    B2 = 3000
    t2 = jax.random.uniform(jax.random.PRNGKey(1), (B2, N_INPUT), jnp.float32)
    out2 = jax.block_until_ready(nn_forward(t2, *params))
    ref2 = nn_reference(t2, *params)
    assert out2.shape == (B2, N_OUTPUT), out2.shape
    assert jnp.allclose(out2, ref2, atol=2e-2, rtol=2e-2), "mismatch vs reference (bf16 tiled path)"

    print("KERNEL_OK")
</pallas_src>

<mosaic_0001>
module attributes {stable_mosaic.version = 11 : i64} {
  func.func @nn_kernel(%arg0: i32, %arg1: memref<1x8xf32, #tpu.memory_space<vmem>>, %arg2: memref<32x1xf32, #tpu.memory_space<vmem>>, %arg3: memref<32x1xf32, #tpu.memory_space<vmem>>, %arg4: memref<2x32x32xf32, #tpu.memory_space<vmem>>, %arg5: memref<2x32x1xf32, #tpu.memory_space<vmem>>, %arg6: memref<2x32xf32, #tpu.memory_space<vmem>>, %arg7: memref<2x1xf32, #tpu.memory_space<vmem>>, %arg8: memref<2x8xf32, #tpu.memory_space<vmem>>) attributes {dimension_semantics = [#tpu.dimension_semantics<parallel>], iteration_bounds = array<i64: 1>, scalar_prefetch = 0 : i64, scratch_operands = 0 : i64, tpu.core_type = #tpu.core_type<tc>, window_params = [{transform_indices = @transform_0, window_bounds = array<i64: 1, 8>}, {pipeline_mode = #tpu.pipeline_mode<synchronous>, transform_indices = @transform_1, window_bounds = array<i64: 32, 1>}, {pipeline_mode = #tpu.pipeline_mode<synchronous>, transform_indices = @transform_2, window_bounds = array<i64: 32, 1>}, {pipeline_mode = #tpu.pipeline_mode<synchronous>, transform_indices = @transform_3, window_bounds = array<i64: 2, 32, 32>}, {pipeline_mode = #tpu.pipeline_mode<synchronous>, transform_indices = @transform_4, window_bounds = array<i64: 2, 32, 1>}, {pipeline_mode = #tpu.pipeline_mode<synchronous>, transform_indices = @transform_5, window_bounds = array<i64: 2, 32>}, {pipeline_mode = #tpu.pipeline_mode<synchronous>, transform_indices = @transform_6, window_bounds = array<i64: 2, 1>}, {transform_indices = @transform_7, window_bounds = array<i64: 2, 8>}]} {
    %c0 = arith.constant 0 : index
    %c0_0 = arith.constant 0 : index
    %0 = vector.load %arg1[%c0, %c0_0] : memref<1x8xf32, #tpu.memory_space<vmem>>, vector<1x8xf32>
    %c0_1 = arith.constant 0 : index
    %c0_2 = arith.constant 0 : index
    %1 = vector.load %arg2[%c0_1, %c0_2] : memref<32x1xf32, #tpu.memory_space<vmem>>, vector<32x1xf32>
    %2 = vector.broadcast %1 : vector<32x1xf32> to vector<32x8xf32>
    %3 = vector.broadcast %0 : vector<1x8xf32> to vector<32x8xf32>
    %4 = arith.mulf %2, %3 : vector<32x8xf32>
    %c0_3 = arith.constant 0 : index
    %c0_4 = arith.constant 0 : index
    %5 = vector.load %arg3[%c0_3, %c0_4] : memref<32x1xf32, #tpu.memory_space<vmem>>, vector<32x1xf32>
    %6 = vector.broadcast %5 : vector<32x1xf32> to vector<32x8xf32>
    %7 = arith.addf %4, %6 : vector<32x8xf32>
    %8 = math.tanh %7 : vector<32x8xf32>
    %c0_5 = arith.constant 0 : index
    %c0_6 = arith.constant 0 : index
    %c0_7 = arith.constant 0 : index
    %9 = vector.load %arg4[%c0_5, %c0_6, %c0_7] : memref<2x32x32xf32, #tpu.memory_space<vmem>>, vector<1x32x32xf32>
    %10 = vector.shape_cast %9 : vector<1x32x32xf32> to vector<32x32xf32>
    %cst = arith.constant dense<0.000000e+00> : vector<32x8xf32>
    %11 = tpu.matmul %10, %8, %cst {dimension_numbers = #tpu.dot_dimension_numbers<[1], [0], [0], [1], [0, 0, 1, 1], [], []>} : vector<32x32xf32>, vector<32x8xf32>, vector<32x8xf32> -> vector<32x8xf32>
    %c0_8 = arith.constant 0 : index
    %c0_9 = arith.constant 0 : index
    %c0_10 = arith.constant 0 : index
    %12 = vector.load %arg5[%c0_8, %c0_9, %c0_10] : memref<2x32x1xf32, #tpu.memory_space<vmem>>, vector<1x32x1xf32>
    %13 = vector.shape_cast %12 : vector<1x32x1xf32> to vector<32x1xf32>
    %14 = vector.broadcast %13 : vector<32x1xf32> to vector<32x8xf32>
    %15 = arith.addf %11, %14 : vector<32x8xf32>
    %16 = math.tanh %15 : vector<32x8xf32>
    %c1 = arith.constant 1 : index
    %c0_11 = arith.constant 0 : index
    %c0_12 = arith.constant 0 : index
    %17 = vector.load %arg4[%c1, %c0_11, %c0_12] : memref<2x32x32xf32, #tpu.memory_space<vmem>>, vector<1x32x32xf32>
    %18 = vector.shape_cast %17 : vector<1x32x32xf32> to vector<32x32xf32>
    %cst_13 = arith.constant dense<0.000000e+00> : vector<32x8xf32>
    %19 = tpu.matmul %18, %16, %cst_13 {dimension_numbers = #tpu.dot_dimension_numbers<[1], [0], [0], [1], [0, 0, 1, 1], [], []>} : vector<32x32xf32>, vector<32x8xf32>, vector<32x8xf32> -> vector<32x8xf32>
    %c1_14 = arith.constant 1 : index
    %c0_15 = arith.constant 0 : index
    %c0_16 = arith.constant 0 : index
    %20 = vector.load %arg5[%c1_14, %c0_15, %c0_16] : memref<2x32x1xf32, #tpu.memory_space<vmem>>, vector<1x32x1xf32>
    %21 = vector.shape_cast %20 : vector<1x32x1xf32> to vector<32x1xf32>
    %22 = vector.broadcast %21 : vector<32x1xf32> to vector<32x8xf32>
    %23 = arith.addf %19, %22 : vector<32x8xf32>
    %24 = math.tanh %23 : vector<32x8xf32>
    %c0_17 = arith.constant 0 : index
    %c0_18 = arith.constant 0 : index
    %25 = vector.load %arg6[%c0_17, %c0_18] : memref<2x32xf32, #tpu.memory_space<vmem>>, vector<2x32xf32>
    %cst_19 = arith.constant dense<0.000000e+00> : vector<2x8xf32>
    %26 = tpu.matmul %25, %24, %cst_19 {dimension_numbers = #tpu.dot_dimension_numbers<[1], [0], [0], [1], [0, 0, 1, 1], [], []>} : vector<2x32xf32>, vector<32x8xf32>, vector<2x8xf32> -> vector<2x8xf32>
    %c0_20 = arith.constant 0 : index
    %c0_21 = arith.constant 0 : index
    %27 = vector.load %arg7[%c0_20, %c0_21] : memref<2x1xf32, #tpu.memory_space<vmem>>, vector<2x1xf32>
    %28 = vector.broadcast %27 : vector<2x1xf32> to vector<2x8xf32>
    %29 = arith.addf %26, %28 : vector<2x8xf32>
    %cst_22 = arith.constant 2.000000e+00 : f32
    %30 = vector.broadcast %cst_22 : f32 to vector<1x8xf32>
    %31 = arith.mulf %30, %0 : vector<1x8xf32>
    %cst_23 = arith.constant 1.000000e+00 : f32
    %32 = vector.broadcast %cst_23 : f32 to vector<1x8xf32>
    %33 = arith.subf %31, %32 : vector<1x8xf32>
    %cst_24 = arith.constant 1.000000e+00 : f32
    %34 = vector.broadcast %cst_24 : f32 to vector<1x8xf32>
    %35 = arith.subf %34, %0 : vector<1x8xf32>
    %36 = arith.mulf %0, %35 : vector<1x8xf32>
    %cst_25 = arith.constant 9.99999993E-9 : f32
    %37 = vector.broadcast %cst_25 : f32 to vector<1x8xf32>
    %38 = arith.addf %36, %37 : vector<1x8xf32>
    %39 = vector.broadcast %38 : vector<1x8xf32> to vector<2x8xf32>
    %40 = arith.mulf %39, %29 : vector<2x8xf32>
    %41 = vector.broadcast %33 : vector<1x8xf32> to vector<2x8xf32>
    %42 = arith.addf %41, %40 : vector<2x8xf32>
    %c0_26 = arith.constant 0 : index
    %c0_27 = arith.constant 0 : index
    %43 = vector.load %arg8[%c0_26, %c0_27] : memref<2x8xf32, #tpu.memory_space<vmem>>, vector<2x8xf32>
    tpu.vector_store %arg8[%c0_26, %c0_27], %42 {strides = array<i32>} : memref<2x8xf32, #tpu.memory_space<vmem>>, vector<2x8xf32>,
    return
  }
  func.func @transform_0(%arg0: i32) -> (i32, i32) {
    %c0_i32 = arith.constant 0 : i32
    %c0_i32_0 = arith.constant 0 : i32
    return %c0_i32, %arg0 : i32, i32
  }
  func.func @transform_1(%arg0: i32) -> (i32, i32) {
    %c0_i32 = arith.constant 0 : i32
    %c0_i32_0 = arith.constant 0 : i32
    %c0_i32_1 = arith.constant 0 : i32
    return %c0_i32, %c0_i32_0 : i32, i32
  }
  func.func @transform_2(%arg0: i32) -> (i32, i32) {
    %c0_i32 = arith.constant 0 : i32
    %c0_i32_0 = arith.constant 0 : i32
    %c0_i32_1 = arith.constant 0 : i32
    return %c0_i32, %c0_i32_0 : i32, i32
  }
  func.func @transform_3(%arg0: i32) -> (i32, i32, i32) {
    %c0_i32 = arith.constant 0 : i32
    %c0_i32_0 = arith.constant 0 : i32
    %c0_i32_1 = arith.constant 0 : i32
    %c0_i32_2 = arith.constant 0 : i32
    return %c0_i32, %c0_i32_0, %c0_i32_1 : i32, i32, i32
  }
  func.func @transform_4(%arg0: i32) -> (i32, i32, i32) {
    %c0_i32 = arith.constant 0 : i32
    %c0_i32_0 = arith.constant 0 : i32
    %c0_i32_1 = arith.constant 0 : i32
    %c0_i32_2 = arith.constant 0 : i32
    return %c0_i32, %c0_i32_0, %c0_i32_1 : i32, i32, i32
  }
  func.func @transform_5(%arg0: i32) -> (i32, i32) {
    %c0_i32 = arith.constant 0 : i32
    %c0_i32_0 = arith.constant 0 : i32
    %c0_i32_1 = arith.constant 0 : i32
    return %c0_i32, %c0_i32_0 : i32, i32
  }
  func.func @transform_6(%arg0: i32) -> (i32, i32) {
    %c0_i32 = arith.constant 0 : i32
    %c0_i32_0 = arith.constant 0 : i32
    %c0_i32_1 = arith.constant 0 : i32
    return %c0_i32, %c0_i32_0 : i32, i32
  }
  func.func @transform_7(%arg0: i32) -> (i32, i32) {
    %c0_i32 = arith.constant 0 : i32
    %c0_i32_0 = arith.constant 0 : i32
    return %c0_i32, %arg0 : i32, i32
  }
}

</mosaic_0001>

<bundles_post_ra>
// kernel: tpu_custom_call.1
= control target key start
LH: loop header
LB: loop body
LE: loop exit
PB: predicated region body
PF: predicated region fallthrough
CT: control target
= control target key end

     0   :  { %v383_v3 = vmov 0   ;;  %s521_s0 = inlined_call_operand.vmem [shape: f32[1,8], index: 0, kind: input, shape index: {}]   ;;  %s522_s1 = inlined_call_operand.vmem [shape: f32[32,1], index: 1, kind: input, shape index: {}]   ;;  %s523_s2 = inlined_call_operand.vmem [shape: f32[32,1], index: 2, kind: input, shape index: {}]   ;;  %s524_s3 = inlined_call_operand.vmem [shape: f32[2,32,32], index: 3, kind: input, shape index: {}]   ;;  %s525_s4 = inlined_call_operand.vmem [shape: f32[2,32,1], index: 4, kind: input, shape index: {}]   ;;  %s526_s5 = inlined_call_operand.vmem [shape: f32[2,32], index: 5, kind: input, shape index: {}]   ;;  %s527_s6 = inlined_call_operand.vmem [shape: f32[2,1], index: 6, kind: input, shape index: {}]   ;;  %s528_s7 = inlined_call_operand.hbm [shape: f32[2,8], index: 7, kind: output, shape index: {}]  }
   0x1   :  { %v61_v0 = vld [vmem:[%s523_s2 + $0x10] sm:$0xff]  ;;  %v62_v1 = vld [vmem:[%s523_s2 + $0x18] sm:$0xff]  ;;  %331 = vset.pattern.permute.xlu2 %v383_v3  ;;  %330 = vset.pattern.permute.xlu1 %v383_v3 }
   0x2   :  { %v31_v2 = vld [vmem:[%s522_s1 + $0x18] sm:$0xff]  ;;  %329 = vset.pattern.permute.xlu0 %v383_v3  ;;  %75 = vperm.xlu2 %331, %v61_v0  }
   0x3   :  { %80 = vperm.xlu1 %330, %v62_v1   ;;  %49 = vperm.xlu0 %329, %v31_v2  }
   0x4   :  { %12 = vsyncpa [#allocation3], 0  ;;  %v28_v4 = vld [vmem:[%s522_s1] sm:$0xff]  ;;  %v30_v5 = vld [vmem:[%s522_s1 + $0x10] sm:$0xff]  ;;  %vm119_vm0 = vcmask 261120   ;;  %s384_s27 = smov [#allocation2]  }
   0x5   :  { %v29_v6 = vld [vmem:[%s522_s1 + $0x8] sm:$0xff]  ;;  %v98_v7 = vld [vmem:[%s525_s4 + $0x18] sm:$0xff]  ;;  %v59_v9 = vld [vmem:[%s523_s2] sm:$0xff]  ;;  %s292_s30 = sshll.u32 %s528_s7, 4  ;;  %vm283_vm1 = vcmask 58368   ;;  %s293_s30 = int_to_ptr.hbm [resolvable:$true] %s292_s30 }
   0x6   :  { %v60_v8 = vld [vmem:[%s523_s2 + $0x8] sm:$0xff]  ;;  %v95_v10 = vld [vmem:[%s525_s4] sm:$0xff]  ;;  %v97_v11 = vld [vmem:[%s525_s4 + $0x10] sm:$0xff] }
   0x7   :  { %v96_v12 = vld [vmem:[%s525_s4 + $0x8] sm:$0xff]  ;;  %v312_v14 = vld [vmem:[%s525_s4 + $0x38] sm:$0xff]  ;;  %v311_v15 = vld [vmem:[%s525_s4 + $0x30] sm:$0xff] }
   0x8   :  { %v310_v13 = vld [vmem:[%s525_s4 + $0x28] sm:$0xff]  ;;  %v309_v16 = vld [vmem:[%s525_s4 + $0x20] sm:$0xff]  ;;  %v93_v41 = vld [vmem:[%s524_s3 + $0x10] sm:$0xff] }
   0x9   :  { %v241_v17 = vld [vmem:[%s527_s6] sm:$0x3]  ;;  %v92_v39 = vld [vmem:[%s524_s3 + $0x8] sm:$0xff]  ;;  %v94_v42 = vld [vmem:[%s524_s3 + $0x18] sm:$0xff] }
   0xa   :  { %34 = vperm.xlu2 %331, %v28_v4   ;;  %v332_v18 = vld [vmem:[%s521_s0] ss:$0 sm:$0xff]  ;;  %v306_v59 = vld [vmem:[%s524_s3 + $0x28] sm:$0xff]  ;;  %v307_v61 = vld [vmem:[%s524_s3 + $0x30] sm:$0xff] }
   0xb   :  { %44 = vperm.xlu0 %329, %v30_v5   ;;  %39 = vperm.xlu1 %330, %v29_v6   ;;  %v91_v38 = vld [vmem:[%s524_s3] sm:$0xff]  ;;  %v308_v62 = vld [vmem:[%s524_s3 + $0x38] sm:$0xff] }
   0xc   :  { %v305_v58 = vld [vmem:[%s524_s3 + $0x20] sm:$0xff] }
  0x12   :  { %116 = vperm.xlu2 %331, %v98_v7  }
  0x13   :  { %70 = vperm.xlu0 %329, %v60_v8   ;;  %65 = vperm.xlu1 %330, %v59_v9  }
  0x1a   :  { %101 = vperm.xlu2 %331, %v95_v10  }
  0x1b   :  { %111 = vperm.xlu0 %329, %v97_v11   ;;  %106 = vperm.xlu1 %330, %v96_v12  }
  0x22   :  { %182 = vperm.xlu2 %331, %v310_v13  }
  0x23   :  { %192 = vperm.xlu0 %329, %v312_v14   ;;  %187 = vperm.xlu1 %330, %v311_v15   ;;  %v240_v14 = vld [vmem:[%s526_s5] sm:$0x3]  ;;  %s290_s5 = sshll.u32 %s384_s27, 4  ;;  %s291_s5 = int_to_ptr.vmem [resolvable:$true] %s290_s5 }
  0x2b   :  { %177 = vperm.xlu0 %329, %v309_v16   ;;  %244 = vperm.xlu1 %330, %v241_v17   ;;  %v27_v16 = vld [vmem:[%s521_s0] sm:$0x1] }
  0x2c   :  { %v272_v17 = vsub.f32 1.0, %v27_v16 }
  0x5c   :  { %v76_v23 = vpop.permute.xlu2 %75 }
  0x64   :  { %v35_v29 = vpop.permute.xlu2 %34 }
  0x65   :  { %v55_v30 = vmul.f32 %v332_v18, %v35_v29 }
  0x6c   :  { %v117_v45 = vpop.permute.xlu2 %116 }
  0x74   :  { %v102_v53 = vpop.permute.xlu2 %101 }
  0x75   :  { %v81_v19 = vpop.permute.xlu1 %80  ;;  %v50_v20 = vpop.permute.xlu0 %49 }
  0x76   :  { %v58_v21 = vmul.f32 %v332_v18, %v50_v20 }
  0x78   :  { %v86_v22 = vadd.f32 %v81_v19, %v58_v21  ;;  %v270_v19 = vmul.f32 2.0, %v27_v16 }
  0x7a   :  { %333 = vtanh.f32 %v86_v22  ;;  %v318_v21 = vadd.f32 -1.0, %v270_v19 }
  0x7c   :  { %v183_v6 = vpop.permute.xlu2 %182 }
  0x7d   :  { %v45_v24 = vpop.permute.xlu0 %44  ;;  %v40_v25 = vpop.permute.xlu1 %39 }
  0x7e   :  { %v57_v26 = vmul.f32 %v332_v18, %v45_v24  ;;  %v56_v31 = vmul.f32 %v332_v18, %v40_v25  ;;  %v273_v18 = vmul.f32 %v272_v17, %v27_v16 }
  0x80   :  { %v334_v27 = vpop.eup %333  ;;  %v85_v28 = vadd.f32 %v76_v23, %v57_v26  ;;  %v274_v20 = vadd.f32 1e-08, %v273_v18  ;;  %v280_v26 = vperm.slane %v318_v21, 0 }
  0x81   :  { %144 = vmatpush.msra.mxu0 %v334_v27  ;;  %319 = vmatpush.msra.mxu3 %v334_v27 }
  0x82   :  { %335 = vtanh.f32 %v85_v28  ;;  %v276_v22 = vperm.slane %v274_v20, 0 }
  0x85   :  { %v71_v32 = vpop.permute.xlu0 %70  ;;  %v66_v33 = vpop.permute.xlu1 %65 }
  0x86   :  { %v84_v34 = vadd.f32 %v71_v32, %v56_v31  ;;  %v83_v35 = vadd.f32 %v66_v33, %v55_v30 }
  0x88   :  { %v336_v36 = vpop.eup %335  ;;  %337 = vtanh.f32 %v84_v34 }
  0x89   :  { %145 = vmatpush.msra.mxu0 %v336_v36  ;;  %320 = vmatpush.msra.mxu3 %v336_v36  ;;  %339 = vtanh.f32 %v83_v35 }
  0x8d   :  { %v112_v46 = vpop.permute.xlu0 %111  ;;  %v107_v50 = vpop.permute.xlu1 %106 }
  0x8e   :  { %v338_v37 = vpop.eup %337 }
  0x8f   :  { %146 = vmatpush.msra.mxu0 %v338_v37  ;;  %321 = vmatpush.msra.mxu3 %v338_v37  ;;  %v340_v40 = vpop.eup %339 }
  0x91   :  { %147 = vmatpush.msra.mxu0 %v340_v40  ;;  %322 = vmatpush.msra.mxu3 %v340_v40 }
  0x92   :  { %301 = vmatmul.msk.f32.vlgmr.msra.gmra.mxu0 %vm119_vm0, %v91_v38  ;;  %302 = vmatmul.msk.f32.vlgmr.msra.gmra.mxu3 %vm119_vm0, %v92_v39 }
  0x95   :  { %v193_v1 = vpop.permute.xlu0 %192  ;;  %v188_v2 = vpop.permute.xlu1 %187 }
  0x9a   :  { %303 = vmatmul.msk.f32.gmra.mxu3 %vm119_vm0, %v93_v41 }
  0x9d   :  { %v178_v9 = vpop.permute.xlu0 %177  ;;  %v245_v23 = vpop.permute.xlu1 %244 }
  0xa2   :  { %304 = vmatmul.msk.f32.gmra.mxu3 %vm119_vm0, %v94_v42 }
 0x10f   :  { %v149_v51 = vpop.f32.mrf.mxu0 }
 0x110   :  { %v150_v54 = vadd.f32 %v149_v51, %v102_v53 }
 0x115   :  { %v152_v43 = vpop.f32.mrf.mxu3 }
 0x116   :  { %v153_v52 = vadd.f32 %v152_v43, %v107_v50 }
 0x11d   :  { %v155_v44 = vpop.f32.mrf.mxu3 }
 0x11e   :  { %v156_v48 = vadd.f32 %v155_v44, %v112_v46 }
 0x125   :  { %v158_v47 = vpop.f32.mrf.mxu3 }
 0x126   :  { %v159_v49 = vadd.f32 %v158_v47, %v117_v45 }
 0x128   :  { %341 = vtanh.f32 %v159_v49 }
 0x129   :  { %343 = vtanh.f32 %v156_v48 }
 0x12a   :  { %345 = vtanh.f32 %v153_v52 }
 0x12b   :  { %347 = vtanh.f32 %v150_v54 }
 0x12e   :  { %v342_v55 = vpop.eup %341 }
 0x12f   :  { %219 = vmatpush.msrb.mxu0 %v342_v55  ;;  %323 = vmatpush.msra.mxu1 %v342_v55  ;;  %v344_v56 = vpop.eup %343 }
 0x130   :  { %v346_v57 = vpop.eup %345 }
 0x131   :  { %220 = vmatpush.msrb.mxu0 %v344_v56  ;;  %324 = vmatpush.msra.mxu1 %v344_v56  ;;  %v348_v60 = vpop.eup %347 }
 0x133   :  { %221 = vmatpush.msrb.mxu0 %v346_v57  ;;  %325 = vmatpush.msra.mxu1 %v346_v57 }
 0x135   :  { %222 = vmatpush.msrb.mxu0 %v348_v60  ;;  %326 = vmatpush.msra.mxu1 %v348_v60 }
 0x136   :  { %313 = vmatmul.msk.f32.vlgmr.msrb.gmra.mxu0 %vm119_vm0, %v305_v58  ;;  %314 = vmatmul.msk.f32.vlgmr.msra.gmra.mxu1 %vm119_vm0, %v306_v59 }
 0x13e   :  { %315 = vmatmul.msk.f32.gmra.mxu1 %vm119_vm0, %v307_v61 }
 0x146   :  { %316 = vmatmul.msk.f32.gmra.mxu1 %vm119_vm0, %v308_v62 }
 0x1b3   :  { %v227_v63 = vpop.f32.mrf.mxu1  ;;  %v224_v7 = vpop.f32.mrf.mxu0 }
 0x1b4   :  { %v228_v8 = vadd.f32 %v227_v63, %v183_v6  ;;  %v225_v10 = vadd.f32 %v224_v7, %v178_v9 }
 0x1bb   :  { %v230_v0 = vpop.f32.mrf.mxu1 }
 0x1bc   :  { %v231_v4 = vadd.f32 %v230_v0, %v188_v2 }
 0x1c3   :  { %v233_v3 = vpop.f32.mrf.mxu1 }
 0x1c4   :  { %v234_v5 = vadd.f32 %v233_v3, %v193_v1 }
 0x1c6   :  { %349 = vtanh.f32 %v234_v5 }
 0x1c7   :  { %351 = vtanh.f32 %v231_v4 }
 0x1c8   :  { %353 = vtanh.f32 %v228_v8 }
 0x1c9   :  { %355 = vtanh.f32 %v225_v10 }
 0x1cc   :  { %v350_v11 = vpop.eup %349 }
 0x1cd   :  { %262 = vmatpush.msra.mxu2 %v350_v11  ;;  %v352_v12 = vpop.eup %351 }
 0x1ce   :  { %v354_v13 = vpop.eup %353 }
 0x1cf   :  { %263 = vmatpush.msra.mxu2 %v352_v12  ;;  %v356_v15 = vpop.eup %355 }
 0x1d1   :  { %264 = vmatpush.msra.mxu2 %v354_v13 }
 0x1d3   :  { %265 = vmatpush.msra.mxu2 %v356_v15 }
 0x1d4   :  { %317 = vmatmul.msk.f32.vlgmr.msra.gmra.mxu2 %vm119_vm0, %v240_v14 }
 0x257   :  { %v267_v24 = vpop.f32.mrf.mxu2 }
 0x258   :  { %v268_v25 = vadd.f32 %v267_v24, %v245_v23 }
 0x25a   :  { %v278_v27 = vmul.f32 %v276_v22, %v268_v25 }
 0x25c   :  { %v282_v28 = vadd.f32 %v280_v26, %v278_v27 }
 0x25e   :  { %284 = vst.msk [vmem:[#allocation2] sm:$0x3] %vm283_vm1, %v282_v28 }
 0x25f   :  { %295 = dma.vmem_to_hbm [thread:$0]  %s291_s5, 32, %s293_s30, [#allocation3]  }
 0x260   :  { %381 = dma.done.wait [#allocation3], 32  }
 0x261   :  { %382 = vsyncadd [#allocation3], 4294967264 }
 0x262   :  { %300 = vsyncpa [#allocation3], 1 }

</bundles_post_ra>
